<compile_context>
chip_gen: v7x
topology: tpu7x:2x2x1
jax: 0.10.0
libtpu: 0.0.40
codegen_flags: <defaults>
</compile_context>

<pallas_src>
import functools

import jax
import jax.numpy as jnp
from jax.experimental import pallas as pl
from jax.experimental.pallas import tpu as pltpu


def _avg_pool_kernel(x_ref, o_ref, acc_ref, *, seq_len, tl):
    # x_ref:   (1, tl, td)  input tile (batch block pinned to batch 0)
    # o_ref:   (1, td)      output tile (resident across the L/reduction axis)
    # acc_ref: (1, td)      f32 accumulator scratch
    i = pl.program_id(1)  # L-tile index (innermost, reduction axis)

    @pl.when(i == 0)
    def _():
        acc_ref[...] = jnp.zeros_like(acc_ref)

    x = x_ref[0].astype(jnp.float32)  # (tl, td)
    # Mask rows past the true sequence length (tail tile when L % tl != 0).
    row = i * tl + jax.lax.broadcasted_iota(jnp.int32, x.shape, 0)
    x = jnp.where(row < seq_len, x, 0.0)

    acc_ref[...] += jnp.sum(x, axis=0, keepdims=True)

    @pl.when(i == pl.num_programs(1) - 1)
    def _():
        o_ref[...] = (acc_ref[...] * (1.0 / seq_len)).astype(o_ref.dtype)


def avg_pooling(inputs):
    """inputs: (B, L, D).  Returns inputs.mean(axis=1)[0], shape (D,)."""
    assert inputs.ndim == 3, inputs.shape
    _, seq_len, dim = inputs.shape

    # L tile: whole sequence when small, else 512 rows (multiple of 8 for the
    # sublane tiling constraint); the tail tile is masked inside the kernel.
    tl = seq_len if seq_len <= 512 else 512
    # D tile: keep the full lane axis unless D is large and cleanly divisible.
    td = 512 if (dim > 512 and dim % 512 == 0) else dim

    grid = (pl.cdiv(dim, td), pl.cdiv(seq_len, tl))
    kernel = functools.partial(_avg_pool_kernel, seq_len=seq_len, tl=tl)

    out = pl.pallas_call(
        kernel,
        out_shape=jax.ShapeDtypeStruct((1, dim), inputs.dtype),
        grid=grid,
        in_specs=[pl.BlockSpec((1, tl, td), lambda j, i: (0, i, j))],
        out_specs=pl.BlockSpec((1, td), lambda j, i: (0, j)),
        scratch_shapes=[pltpu.VMEM((1, td), jnp.float32)],
        compiler_params=pltpu.CompilerParams(
            dimension_semantics=("parallel", "arbitrary")),
    )(inputs)
    return out[0]  # shape (D,) == inputs.mean(dim=1)[0]


if __name__ == "__main__":
    key = jax.random.PRNGKey(0)
    k1, k2 = jax.random.split(key)

    # Small shape consistent with the module's 3-D input: batch=2, seq=8, hidden=32.
    x_small = jax.random.normal(k1, (2, 8, 32), dtype=jnp.float32)
    out_small = jax.block_until_ready(avg_pooling(x_small))
    ref_small = jnp.mean(x_small, axis=1)[0]
    assert out_small.shape == (32,), out_small.shape
    assert jnp.allclose(out_small, ref_small, atol=1e-5, rtol=1e-5), \
        "mismatch vs reference (small)"

    # Larger shape to exercise the tiled reduction grid and tail masking
    # (L=520 -> two 512-row L tiles, second one partially masked).
    x_big = jax.random.normal(k2, (3, 520, 256), dtype=jnp.float32)
    out_big = jax.block_until_ready(avg_pooling(x_big))
    ref_big = jnp.mean(x_big, axis=1)[0]
    assert out_big.shape == (256,), out_big.shape
    assert jnp.allclose(out_big, ref_big, atol=1e-4, rtol=1e-4), \
        "mismatch vs reference (big)"

    print("KERNEL_OK")
</pallas_src>

<mosaic_0001>
module attributes {stable_mosaic.version = 11 : i64} {
  func.func @_avg_pool_kernel(%arg0: i32, %arg1: i32, %arg2: memref<1x8x32xf32, #tpu.memory_space<vmem>>, %arg3: memref<1x32xf32, #tpu.memory_space<vmem>>, %arg4: memref<1x32xf32, #tpu.memory_space<vmem>>) attributes {dimension_semantics = [#tpu.dimension_semantics<parallel>, #tpu.dimension_semantics<arbitrary>], iteration_bounds = array<i64: 1, 1>, scalar_prefetch = 0 : i64, scratch_operands = 1 : i64, tpu.core_type = #tpu.core_type<tc>, window_params = [{transform_indices = @transform_0, window_bounds = array<i64: 1, 8, 32>}, {transform_indices = @transform_1, window_bounds = array<i64: 1, 32>}]} {
    %c0_i32 = arith.constant 0 : i32
    %0 = arith.cmpi eq, %arg1, %c0_i32 : i32
    %1 = arith.extui %0 : i1 to i32
    %c0_i32_0 = arith.constant 0 : i32
    %2 = arith.cmpi ne, %1, %c0_i32_0 : i32
    scf.if %2 {
      %cst_11 = arith.constant 0.000000e+00 : f32
      %21 = vector.broadcast %cst_11 : f32 to vector<1x32xf32>
      %c0_12 = arith.constant 0 : index
      %c0_13 = arith.constant 0 : index
      %22 = vector.load %arg4[%c0_12, %c0_13] : memref<1x32xf32, #tpu.memory_space<vmem>>, vector<1x32xf32>
      tpu.vector_store %arg4[%c0_12, %c0_13], %21 {strides = array<i32>} : memref<1x32xf32, #tpu.memory_space<vmem>>, vector<1x32xf32>,
    } else {
    }
    %c0 = arith.constant 0 : index
    %c0_1 = arith.constant 0 : index
    %c0_2 = arith.constant 0 : index
    %3 = vector.load %arg2[%c0, %c0_1, %c0_2] : memref<1x8x32xf32, #tpu.memory_space<vmem>>, vector<1x8x32xf32>
    %4 = vector.shape_cast %3 : vector<1x8x32xf32> to vector<8x32xf32>
    %c8_i32 = arith.constant 8 : i32
    %5 = arith.muli %arg1, %c8_i32 : i32
    %6 = tpu.iota {dimensions = array<i32: 0>} : vector<8x32xi32>
    %7 = vector.broadcast %5 : i32 to vector<8x32xi32>
    %8 = arith.addi %7, %6 : vector<8x32xi32>
    %c8_i32_3 = arith.constant 8 : i32
    %9 = vector.broadcast %c8_i32_3 : i32 to vector<8x32xi32>
    %10 = arith.cmpi slt, %8, %9 : vector<8x32xi32>
    %cst = arith.constant 0.000000e+00 : f32
    %11 = vector.broadcast %cst : f32 to vector<8x32xf32>
    %12 = arith.select %10, %4, %11 : vector<8x32xi1>, vector<8x32xf32>
    %c0_4 = arith.constant 0 : index
    %c0_5 = arith.constant 0 : index
    %13 = vector.load %arg4[%c0_4, %c0_5] : memref<1x32xf32, #tpu.memory_space<vmem>>, vector<1x32xf32>
    %cst_6 = arith.constant dense<0.000000e+00> : vector<32xf32>
    %14 = vector.multi_reduction <add>, %12, %cst_6 [0] : vector<8x32xf32> to vector<32xf32>
    %15 = vector.shape_cast %14 : vector<32xf32> to vector<1x32xf32>
    %16 = arith.addf %13, %15 : vector<1x32xf32>
    %c0_7 = arith.constant 0 : index
    %c0_8 = arith.constant 0 : index
    %17 = vector.load %arg4[%c0_7, %c0_8] : memref<1x32xf32, #tpu.memory_space<vmem>>, vector<1x32xf32>
    tpu.vector_store %arg4[%c0_7, %c0_8], %16 {strides = array<i32>} : memref<1x32xf32, #tpu.memory_space<vmem>>, vector<1x32xf32>,
    %c0_i32_9 = arith.constant 0 : i32
    %18 = arith.cmpi eq, %arg1, %c0_i32_9 : i32
    %19 = arith.extui %18 : i1 to i32
    %c0_i32_10 = arith.constant 0 : i32
    %20 = arith.cmpi ne, %19, %c0_i32_10 : i32
    scf.if %20 {
      %c0_11 = arith.constant 0 : index
      %c0_12 = arith.constant 0 : index
      %21 = vector.load %arg4[%c0_11, %c0_12] : memref<1x32xf32, #tpu.memory_space<vmem>>, vector<1x32xf32>
      %cst_13 = arith.constant 1.250000e-01 : f32
      %22 = vector.broadcast %cst_13 : f32 to vector<1x32xf32>
      %23 = arith.mulf %21, %22 : vector<1x32xf32>
      %c0_14 = arith.constant 0 : index
      %c0_15 = arith.constant 0 : index
      %24 = vector.load %arg3[%c0_14, %c0_15] : memref<1x32xf32, #tpu.memory_space<vmem>>, vector<1x32xf32>
      tpu.vector_store %arg3[%c0_14, %c0_15], %23 {strides = array<i32>} : memref<1x32xf32, #tpu.memory_space<vmem>>, vector<1x32xf32>,
    } else {
    }
    return
  }
  func.func @transform_0(%arg0: i32, %arg1: i32) -> (i32, i32, i32) {
    %c0_i32 = arith.constant 0 : i32
    %c0_i32_0 = arith.constant 0 : i32
    return %c0_i32, %arg1, %arg0 : i32, i32, i32
  }
  func.func @transform_1(%arg0: i32, %arg1: i32) -> (i32, i32) {
    %c0_i32 = arith.constant 0 : i32
    %c0_i32_0 = arith.constant 0 : i32
    return %c0_i32, %arg0 : i32, i32
  }
}

</mosaic_0001>

<bundles_post_ra>
// kernel: tpu_custom_call.1
= control target key start
LH: loop header
LB: loop body
LE: loop exit
PB: predicated region body
PF: predicated region fallthrough
CT: control target
= control target key end

     0   :  { %6 = vsyncpa [#allocation4], 0  ;;  %s162_s0 = inlined_call_operand.hbm [shape: f32[2,8,32], index: 0, kind: input, shape index: {}]   ;;  %s163_s1 = inlined_call_operand.hbm [shape: f32[1,32], index: 1, kind: output, shape index: {}]  }
   0x1   :  { %7 = vsyncpa [#allocation5], 0  ;;  %s119_s6 = smov [#allocation3]   ;;  %s71_s10 = scalar_lea.hbm %s162_s0, 128 }
   0x2   :  { %s14_s7 = sshll.u32 %s119_s6, 4  ;;  %p72_p0 = scmp.ne.s32.totalorder %s162_s0, %s71_s10  ;;  %s15_s7 = int_to_ptr.vmem [resolvable:$true] %s14_s7 }
   0x3   :  { %s73_s15 = scalar_lea.hbm %s162_s0, 256  ;;  %p75_p2 = scmp.lt.u32.totalorder %s71_s10, %s162_s0 }
   0x4   :  { %p74_p1 = scmp.lt.u32.totalorder %s73_s15, %s71_s10 }
   0x6   :  { %p76_p3 = por %p75_p2, %p74_p1 }
   0x8   :  { %p77_p4 = pnand %p76_p3, %p72_p0 }
   0xa   :  { %80 = shalt.err (!%p77_p4)
}
   0xb   :  { %s81_s18 = scalar_lea.vmem %s15_s7, 128  ;;  %p86_p6 = scmp.lt.s32.totalorder %s15_s7, %s15_s7 }
   0xc   :  { %p82_p5 = scmp.ne.s32.totalorder %s15_s7, %s81_s18  ;;  %p87_p7 = scmp.lt.s32.totalorder %s81_s18, %s81_s18 }
   0xe   :  { %p88_p8 = por %p87_p7, %p86_p6 }
  0x10   :  { %p89_p9 = pnand %p88_p8, %p82_p5 }
  0x12   :  { %92 = shalt.err (!%p89_p9)
}
  0x13   :  { %17 = dma.hbm_to_vmem [thread:$0]  %s162_s0, 128, %s15_s7, [#allocation4]  }
  0x14   :  { %115 = dma.done.wait [#allocation4], 128  }
  0x15   :  { %116 = vsyncadd [#allocation4], 4294967168  ;;  %vm25_vm0 = vcmask 253952   ;;  %v120_v0 = vmov 0.0   ;;  %vm36_vm1 = vcmask 261120   ;;  %v27_v1 = vld [vmem:[#allocation3] sm:$0xff] }
  0x16   :  { %26 = vst.msk [vmem:[#allocation2] sm:$0x1] %vm25_vm0, %v120_v0  ;;  %v37_v2 = vsel %vm36_vm1, %v27_v1, 0.0  ;;  %s121_s0 = smov [#allocation6]  }
  0x17   :  { %v38_v3 = vrot.slane %v37_v2, 4  ;;  %s59_s21 = sshll.u32 %s121_s0, 4  ;;  %s60_s21 = int_to_ptr.vmem [resolvable:$true] %s59_s21 }
  0x18   :  { %s93_s22 = scalar_lea.vmem %s60_s21, 16  ;;  %s97_s23 = scalar_lea.vmem %s60_s21, 32 }
  0x19   :  { %v39_v4 = vadd.f32 %v38_v3, %v37_v2  ;;  %p94_p10 = scmp.ne.s32.totalorder %s60_s21, %s93_s22  ;;  %p98_p11 = scmp.lt.s32.totalorder %s60_s21, %s60_s21 }
  0x1a   :  { %p99_p12 = scmp.lt.s32.totalorder %s97_s23, %s93_s22 }
  0x1b   :  { %v40_v5 = vrot.slane %v39_v4, 2 }
  0x1c   :  { %p100_p13 = por %p99_p12, %p98_p11 }
  0x1d   :  { %v41_v6 = vadd.f32 %v40_v5, %v39_v4  ;;  %v35_v8 = vld [vmem:[#allocation2] sm:$0x1] }
  0x1e   :  { %p101_p0 = pnand %p100_p13, %p94_p10 }
  0x1f   :  { %v42_v7 = vrot.slane %v41_v6, 1 }
  0x21   :  { %v43_v9 = vadd.f32 %v42_v7, %v41_v6 }
  0x23   :  { %v44_v10 = vadd.f32 %v43_v9, %v35_v8 }
  0x25   :  { %46 = vst.msk [vmem:[#allocation2] sm:$0x1] %vm25_vm0, %v44_v10 }
  0x2c   :  { %v50_v11 = vld [vmem:[#allocation2] sm:$0x1] }
  0x2d   :  { %v51_v12 = vmul.f32 0.125, %v50_v11 }
  0x2f   :  { %52 = vst.msk [vmem:[#allocation6] sm:$0x1] %vm25_vm0, %v51_v12 }
  0x30   :  { %104 = shalt.err (!%p101_p0)
}
  0x31   :  { %s105_s26 = scalar_lea.hbm %s163_s1, 16 }
  0x32   :  { %p106_p1 = scmp.ne.s32.totalorder %s163_s1, %s105_s26  ;;  %p109_p2 = scmp.lt.u32.totalorder %s105_s26, %s163_s1 }
  0x34   :  { %p111_p3 = pnand %p109_p2, %p106_p1 }
  0x36   :  { %114 = shalt.err (!%p111_p3)
}
  0x37   :  { %62 = dma.vmem_to_hbm [thread:$0]  %s60_s21, 16, %s163_s1, [#allocation5]  }
  0x38   :  { %117 = dma.done.wait [#allocation5], 16  }
  0x39   :  { %118 = vsyncadd [#allocation5], 4294967280 }
  0x3a   :  { %66 = vsyncpa [#allocation4], 1 }
  0x3b   :  { %67 = vsyncpa [#allocation5], 1 }

</bundles_post_ra>
